<compile_context>
chip_gen: v5e
topology: v5e:2x2
jax: 0.10.0
libtpu: 0.0.40
codegen_flags: <defaults>
</compile_context>

<pallas_src>
import numpy as np
import jax
import jax.numpy as jnp
from jax import lax
from jax.experimental import pallas as pl
from jax.experimental.pallas import tpu as pltpu


def _cdiv(a, b):
    return -(-a // b)


def _round_up(a, b):
    return _cdiv(a, b) * b


# ----------------------------------------------------------------------------
# Minimal host-side stand-in for the sparse hash-tree data structure.
# TODO(synk): the real HashTree (spatial hashing / neighbour search) is a
# host-side index structure with no Pallas equivalent; here it only serves
# deterministic precomputed index tables to the kernels.
# ----------------------------------------------------------------------------
class HashTree:
    DECODER = 0
    DECODER_TMP = 1

    def __init__(self, coords, strides, neighbours):
        self._coords = dict(coords)
        self._strides = dict(strides)
        self._neighbours = neighbours

    def get_coords_size(self, branch, depth):
        return self._coords[(branch, depth)].shape[0]

    def get_coords(self, branch, depth):
        return self._coords[(branch, depth)]

    def get_stride(self, branch, depth):
        return self._strides[(branch, depth)]

    def get_neighbours(self, src_depth, tgt_depth, target_range, branch, conv_based):
        return self._neighbours

    def update_coords(self, branch, depth, coords):
        self._coords[(branch, depth)] = coords


# ----------------------------------------------------------------------------
# Host-side prep for kernel 1: fixed-degree (ELL) neighbour tables.
# ----------------------------------------------------------------------------
def _build_ell_tables(src_ids, tgt_ids, ntypes, n_out, tile_rows=128):
    """Valid-edge filter + fixed-degree (ELL) tables, transposed to (K, n_out_pad).

    w[k, t] = 1/deg(t) for slot k < deg(t), else 0 (zero-weight padding), so the
    kernel's weighted sum reproduces scatter_mean (empty rows -> 0).
    """
    src = np.asarray(src_ids, dtype=np.int64).reshape(-1)
    tgt = np.asarray(tgt_ids, dtype=np.int64).reshape(-1)
    nt = np.asarray(ntypes)
    valid = np.all(nt >= 0, axis=1)
    src_v = src[valid]
    tgt_v = tgt[valid]

    n_out_pad = _round_up(max(n_out, 1), tile_rows)
    counts = np.bincount(tgt_v, minlength=max(n_out, 1)).astype(np.int64)
    kmax = int(counts.max()) if src_v.size else 0
    # Conform-stencil degree is nominally <= 8; bucket K to a multiple of 8 so
    # varying data does not trigger a fresh compile for every new max degree.
    K = _round_up(max(kmax, 1), 8)

    ids_ell = np.zeros((n_out_pad, K), dtype=np.int32)
    w_ell = np.zeros((n_out_pad, K), dtype=np.float32)
    if src_v.size:
        order = np.argsort(tgt_v, kind="stable")
        src_s = src_v[order]
        tgt_s = tgt_v[order]
        row_ptr = np.zeros((counts.size + 1,), dtype=np.int64)
        row_ptr[1:] = np.cumsum(counts)
        slot = np.arange(tgt_s.size, dtype=np.int64) - row_ptr[tgt_s]
        ids_ell[tgt_s, slot] = src_s.astype(np.int32)
        w_ell[tgt_s, slot] = (1.0 / counts[tgt_s]).astype(np.float32)
    return np.ascontiguousarray(ids_ell.T), np.ascontiguousarray(w_ell.T)


# ----------------------------------------------------------------------------
# Kernel 1: ELL scatter-mean as a streaming one-hot contraction on the MXU.
#
# Perf-review changes vs the previous CSR version:
#   * ELL fixed-degree layout (K slots/row, zero-weight padding) -> the slot
#     loop is a static Python unroll; no dynamic trip counts, no per-edge
#     scalar loop, no SMEM edge tables (edges live in VMEM as (K, tile) blocks).
#   * The gather+mean is expressed as featT @ W (one-hot weights built in-kernel
#     from iota/compare) so the feature table is streamed in (C, tile_src)
#     slices over an "arbitrary" reduction grid axis -- no full-table VMEM
#     residency and no double-buffered copy of a constant block (fixes the
#     v7x 64 MiB / v5e 16 MiB scoped-VMEM concerns).
#   * Output is computed transposed, (C, tile_rows=128), so every store is
#     128-lane dense and the whole tile is stored once (no masked per-row vst);
#     the wrapper transposes back (layout plumbing handled by XLA).
# ----------------------------------------------------------------------------
def scatter_mean_ell_pallas(feat, ids_kt, w_kt, n_out, *, tile_rows=128, tile_src=128):
    n_src, c = feat.shape
    K, n_out_pad = ids_kt.shape
    assert n_out_pad % tile_rows == 0
    n_src_pad = _round_up(max(n_src, 1), tile_src)
    num_row_tiles = n_out_pad // tile_rows
    num_src_tiles = n_src_pad // tile_src

    # Transposed, zero-padded feature table (padded columns are never selected,
    # all ids < n_src, so their value is irrelevant).
    feat_t = jnp.zeros((c, n_src_pad), feat.dtype).at[:, :n_src].set(feat.T)

    def kernel(ids_ref, w_ref, ft_ref, o_ref, acc_ref):
        j = pl.program_id(1)

        @pl.when(j == 0)
        def _():
            acc_ref[...] = jnp.zeros_like(acc_ref)

        base = j * tile_src
        # Source-row index of every sublane of the W tile.
        col = lax.broadcasted_iota(jnp.int32, (tile_src, tile_rows), 0)
        ids_local = ids_ref[...] - base           # (K, tile_rows) int32
        wts = w_ref[...]                          # (K, tile_rows) f32
        wt = jnp.zeros((tile_src, tile_rows), jnp.float32)
        for k in range(K):                        # static unroll (fixed degree)
            wt = wt + jnp.where(col == ids_local[k:k + 1, :],
                                wts[k:k + 1, :], 0.0)
        # (C, tile_src) @ (tile_src, tile_rows) on the MXU, f32 accumulate.
        acc_ref[...] += jnp.dot(ft_ref[...].astype(jnp.float32), wt,
                                preferred_element_type=jnp.float32)

        @pl.when(j == pl.num_programs(1) - 1)
        def _():
            o_ref[...] = acc_ref[...].astype(o_ref.dtype)

    flops = 2 * (c + K) * n_src_pad * n_out_pad
    bytes_accessed = (c * n_src_pad * num_row_tiles + c * n_out_pad) * 4 \
        + n_out_pad * K * 8

    out_t = pl.pallas_call(
        kernel,
        out_shape=jax.ShapeDtypeStruct((c, n_out_pad), feat.dtype),
        grid_spec=pltpu.PrefetchScalarGridSpec(
            num_scalar_prefetch=0,
            grid=(num_row_tiles, num_src_tiles),
            in_specs=[
                pl.BlockSpec((K, tile_rows), lambda i, j: (0, i)),
                pl.BlockSpec((K, tile_rows), lambda i, j: (0, i)),
                pl.BlockSpec((c, tile_src), lambda i, j: (0, j)),
            ],
            out_specs=pl.BlockSpec((c, tile_rows), lambda i, j: (0, i)),
            scratch_shapes=[pltpu.VMEM((c, tile_rows), jnp.float32)],
        ),
        compiler_params=pltpu.CompilerParams(
            dimension_semantics=("parallel", "arbitrary")),
        cost_estimate=pl.CostEstimate(flops=int(flops), transcendentals=0,
                                      bytes_accessed=int(bytes_accessed)),
    )(jnp.asarray(ids_kt), jnp.asarray(w_kt), feat_t)
    return out_t[:, :n_out].T


# ----------------------------------------------------------------------------
# Kernel 2: masked gather + x8 replication.
#
# Perf-review changes vs the previous version:
#   * Feature table is copied HBM->VMEM exactly once (pl.ANY input + one-shot
#     manual DMA into a persistent scratch) -> single-buffered, no 2x VMEM cost
#     from a double-buffered constant BlockSpec.
#   * tile_ids raised to 256 (clamped to the problem size) to amortize the
#     ~0.35 us per-grid-step overhead.
#   * ids processed in groups of 8: 8 gathered rows are stacked into an (8, C)
#     block, lane-replicated once (hoisted out of the per-id work, broadcast +
#     reshape instead of per-id concatenate) and stored as a single sublane-
#     and lane-dense slab with `pl.multiple_of` on the store start.
# ----------------------------------------------------------------------------
def repeat8_gather_pallas(feat, sel_ids, tile_ids=256):
    """out[i*8 + k] = feat[sel_ids[i]] for k in 0..7."""
    m = int(np.asarray(sel_ids).shape[0])
    n_src, c = feat.shape
    if m == 0:
        return jnp.zeros((0, c), feat.dtype)

    # Lane packing: put `pack` of the 8 copies side by side along lanes so the
    # output's last dim is a multiple of 128 (unmasked vst).
    pack = 1
    for cand in (8, 4, 2):
        if (c * cand) % 128 == 0:
            pack = cand
            break
    # TODO(synk): when C has no pack factor (e.g. C=48) this falls back to
    # pack=1 and masked-lane stores; a lane-padded output layout would fix it.
    rows_per_id = 8 // pack

    G = 8                                            # ids per inner group
    tile_ids = max(G, min(_round_up(tile_ids, G), _round_up(m, G)))
    num_tiles = _cdiv(m, tile_ids)
    m_pad = num_tiles * tile_ids
    n_groups = tile_ids // G

    ids_pad = np.zeros((m_pad,), dtype=np.int32)
    ids_pad[:m] = np.asarray(sel_ids, dtype=np.int32)
    # TODO(synk): for very large selections the SMEM scalar-prefetch id table
    # should be bucketed / chunked; ids only (not edges) so capacity is mild.

    blk_rows = tile_ids * rows_per_id
    blk_cols = c * pack
    grp_rows = G * rows_per_id

    def kernel(ids_ref, f_hbm, o_ref, f_vmem, sem):
        step = pl.program_id(0)

        # One-shot table load: single VMEM buffer, persists across grid steps.
        @pl.when(step == 0)
        def _():
            cp = pltpu.make_async_copy(f_hbm, f_vmem, sem)
            cp.start()
            cp.wait()

        base = step * tile_ids

        @pl.loop(0, n_groups)
        def _(g):
            # Gather 8 rows (static unroll) and stack them sublane-wise.
            rows = [f_vmem[pl.ds(ids_ref[base + g * G + j], 1), :]
                    for j in range(G)]
            blk = jnp.concatenate(rows, axis=0)                 # (G, C)
            if pack > 1:
                blk = jnp.concatenate([blk] * pack, axis=1)     # (G, C*pack)
            if rows_per_id > 1:
                blk = jnp.broadcast_to(blk[:, None, :],
                                       (G, rows_per_id, blk_cols))
                blk = blk.reshape(grp_rows, blk_cols)
            start = pl.multiple_of(g * grp_rows, grp_rows)
            o_ref[pl.ds(start, grp_rows), :] = blk

    itemsize = np.dtype(feat.dtype).itemsize
    table_bytes = n_src * c * itemsize
    out_bytes = num_tiles * blk_rows * blk_cols * itemsize
    # TODO(synk): for tables larger than ~48 MiB (v7x has 64 MiB VMEM per TC)
    # switch to a tiled table + per-id DMA gather instead of full residency.
    vmem_limit = int(max(32 * 1024 * 1024,
                         table_bytes + 2 * blk_rows * blk_cols * itemsize
                         + 4 * 1024 * 1024))

    out = pl.pallas_call(
        kernel,
        out_shape=jax.ShapeDtypeStruct((m_pad * rows_per_id, blk_cols), feat.dtype),
        grid_spec=pltpu.PrefetchScalarGridSpec(
            num_scalar_prefetch=1,
            grid=(num_tiles,),
            in_specs=[pl.BlockSpec(memory_space=pl.ANY)],
            out_specs=pl.BlockSpec((blk_rows, blk_cols), lambda i, ids: (i, 0)),
            scratch_shapes=[pltpu.VMEM((n_src, c), feat.dtype),
                            pltpu.SemaphoreType.DMA],
        ),
        # "arbitrary": the one-shot table DMA at step 0 must precede all other
        # steps, so the grid axis must not be sharded across megacore TCs.
        compiler_params=pltpu.CompilerParams(
            dimension_semantics=("arbitrary",),
            vmem_limit_bytes=vmem_limit),
        cost_estimate=pl.CostEstimate(flops=0, transcendentals=0,
                                      bytes_accessed=int(table_bytes + out_bytes)),
    )(ids_pad, feat)
    # Packed (m_pad*8/pack, C*pack) rows flatten row-major back to (m_pad*8, C).
    return out.reshape(m_pad * 8, c)[: m * 8]


# ----------------------------------------------------------------------------
# NearestUpsampling forward (JAX/Pallas port of the PyTorch module)
# ----------------------------------------------------------------------------
class NearestUpsampling:
    def __init__(self, target_branch: int = HashTree.DECODER):
        self.target_branch = target_branch
        assert self.target_branch in (HashTree.DECODER, HashTree.DECODER_TMP)

    def __call__(self, hash_tree, feat, feat_depth, mask=None):
        assert feat.shape[0] == hash_tree.get_coords_size(HashTree.DECODER, feat_depth)

        if self.target_branch == HashTree.DECODER_TMP:
            # Boolean masking has a data-dependent size -> resolve indices on
            # the host (glue), as in the original host-side hash-tree code.
            sel_np = np.nonzero(np.asarray(mask))[0].astype(np.int32)
            sel_ids = jnp.asarray(sel_np)
            base_coords = hash_tree.get_coords(HashTree.DECODER, feat_depth)[sel_ids]
            conform_offsets = jnp.array(
                [(0, 0, 0), (0, 0, 1), (0, 1, 0), (0, 1, 1),
                 (1, 0, 0), (1, 0, 1), (1, 1, 0), (1, 1, 1)], dtype=jnp.int32
            ) * hash_tree.get_stride(HashTree.DECODER, feat_depth - 1)
            new_coords = (base_coords[:, None, :] + conform_offsets[None]).reshape(-1, 3)
            hash_tree.update_coords(HashTree.DECODER_TMP, feat_depth - 1, new_coords)
            # Hot path: batched masked row gather + x8 replication (lane-dense).
            output_feats = repeat8_gather_pallas(feat, sel_np)
        else:
            src_ids, tgt_ids, ntypes, _ = hash_tree.get_neighbours(
                feat_depth, feat_depth - 1, target_range=3,
                branch=HashTree.DECODER, conv_based=True)
            n_out = hash_tree.get_coords_size(HashTree.DECODER, feat_depth - 1)
            # Host-side ELL prep (neighbour tables live on the host anyway).
            # TODO(synk): bucket/cache (n_out_pad, K, m) shapes across calls to
            # avoid a fresh pallas_call compile per new sparse point count.
            ids_kt, w_kt = _build_ell_tables(src_ids, tgt_ids, ntypes, n_out)
            output_feats = scatter_mean_ell_pallas(feat, ids_kt, w_kt, n_out)

        return output_feats, feat_depth - 1


# ----------------------------------------------------------------------------
# Demo / self-test
# ----------------------------------------------------------------------------
if __name__ == "__main__":
    key = jax.random.PRNGKey(0)
    k1, k2, k3, k4, k5, k6, k7 = jax.random.split(key, 7)

    depth = 3
    n_coarse = 32   # voxels at feat_depth
    n_fine = 250    # voxels at feat_depth - 1 (deliberately not a tile multiple)
    C = 32          # feature channels
    E = 1024        # neighbour edges

    coords_coarse = jax.random.randint(k1, (n_coarse, 3), 0, 64, dtype=jnp.int32)
    coords_fine = jax.random.randint(k2, (n_fine, 3), 0, 64, dtype=jnp.int32)
    src_ids = jax.random.randint(k3, (E,), 0, n_coarse, dtype=jnp.int32)
    tgt_ids = jax.random.randint(k4, (E,), 0, n_fine, dtype=jnp.int32)
    ntypes = jax.random.randint(k5, (E, 4), -1, 4, dtype=jnp.int32)
    feat = jax.random.normal(k6, (n_coarse, C), jnp.float32)
    mask_np = np.asarray(jax.random.bernoulli(k7, 0.5, (n_coarse,)))
    if not mask_np.any():
        mask_np[0] = True

    tree = HashTree(
        coords={(HashTree.DECODER, depth): coords_coarse,
                (HashTree.DECODER, depth - 1): coords_fine},
        strides={(HashTree.DECODER, depth - 1): 2},
        neighbours=(src_ids, tgt_ids, ntypes, None),
    )

    # --- DECODER branch (default): ELL scatter-mean nearest upsampling ------
    up = NearestUpsampling(HashTree.DECODER)
    out, new_depth = up(tree, feat, depth)
    out = jax.block_until_ready(out)
    assert new_depth == depth - 1
    assert out.shape == (n_fine, C)

    p = jnp.all(ntypes >= 0, axis=1).astype(jnp.float32)[:, None]
    ref_sum = jnp.zeros((n_fine, C), jnp.float32).at[tgt_ids].add(feat[src_ids] * p)
    ref_cnt = jnp.zeros((n_fine, 1), jnp.float32).at[tgt_ids].add(p)
    ref = ref_sum / jnp.maximum(ref_cnt, 1.0)
    # The MXU f32 path may use reduced-precision passes; 2e-3 still catches any
    # indexing/weighting bug (those produce O(1) errors).
    assert jnp.allclose(out, ref, atol=2e-3, rtol=2e-3)

    # --- DECODER_TMP branch: masked x8 replication ---------------------------
    up_tmp = NearestUpsampling(HashTree.DECODER_TMP)
    out_tmp, new_depth_tmp = up_tmp(tree, feat, depth, mask=mask_np)
    out_tmp = jax.block_until_ready(out_tmp)
    assert new_depth_tmp == depth - 1

    sel = jnp.asarray(np.nonzero(mask_np)[0].astype(np.int32))
    ref_tmp = jnp.repeat(feat[sel], 8, axis=0)
    assert out_tmp.shape == ref_tmp.shape
    assert jnp.allclose(out_tmp, ref_tmp)
    assert tree.get_coords(HashTree.DECODER_TMP, depth - 1).shape == (sel.shape[0] * 8, 3)

    print("KERNEL_OK")
</pallas_src>

<mosaic_0001>
module attributes {stable_mosaic.version = 11 : i64} {
  func.func @kernel(%arg0: i32, %arg1: i32, %arg2: memref<8x128xi32, #tpu.memory_space<vmem>>, %arg3: memref<8x128xf32, #tpu.memory_space<vmem>>, %arg4: memref<32x128xf32, #tpu.memory_space<vmem>>, %arg5: memref<32x128xf32, #tpu.memory_space<vmem>>, %arg6: memref<32x128xf32, #tpu.memory_space<vmem>>) attributes {dimension_semantics = [#tpu.dimension_semantics<parallel>, #tpu.dimension_semantics<arbitrary>], iteration_bounds = array<i64: 2, 1>, scalar_prefetch = 0 : i64, scratch_operands = 1 : i64, tpu.core_type = #tpu.core_type<tc>, window_params = [{transform_indices = @transform_0, window_bounds = array<i64: 8, 128>}, {transform_indices = @transform_1, window_bounds = array<i64: 8, 128>}, {transform_indices = @transform_2, window_bounds = array<i64: 32, 128>}, {transform_indices = @transform_3, window_bounds = array<i64: 32, 128>}]} {
    %c0_i32 = arith.constant 0 : i32
    %0 = arith.cmpi eq, %arg1, %c0_i32 : i32
    %1 = arith.extui %0 : i1 to i32
    %c0_i32_0 = arith.constant 0 : i32
    %2 = arith.cmpi ne, %1, %c0_i32_0 : i32
    scf.if %2 {
      %cst_21 = arith.constant 0.000000e+00 : f32
      %90 = vector.broadcast %cst_21 : f32 to vector<32x128xf32>
      %c0_22 = arith.constant 0 : index
      %c0_23 = arith.constant 0 : index
      %91 = vector.load %arg6[%c0_22, %c0_23] : memref<32x128xf32, #tpu.memory_space<vmem>>, vector<32x128xf32>
      tpu.vector_store %arg6[%c0_22, %c0_23], %90 {strides = array<i32>} : memref<32x128xf32, #tpu.memory_space<vmem>>, vector<32x128xf32>,
    } else {
    }
    %c128_i32 = arith.constant 128 : i32
    %3 = arith.muli %arg1, %c128_i32 : i32
    %4 = tpu.iota {dimensions = array<i32: 0>} : vector<128x128xi32>
    %c0 = arith.constant 0 : index
    %c0_1 = arith.constant 0 : index
    %5 = vector.load %arg2[%c0, %c0_1] : memref<8x128xi32, #tpu.memory_space<vmem>>, vector<8x128xi32>
    %6 = vector.broadcast %3 : i32 to vector<8x128xi32>
    %7 = arith.subi %5, %6 : vector<8x128xi32>
    %c0_2 = arith.constant 0 : index
    %c0_3 = arith.constant 0 : index
    %8 = vector.load %arg3[%c0_2, %c0_3] : memref<8x128xf32, #tpu.memory_space<vmem>>, vector<8x128xf32>
    %cst = arith.constant 0.000000e+00 : f32
    %9 = vector.broadcast %cst : f32 to vector<128x128xf32>
    %10 = vector.extract_strided_slice %7 {offsets = [0, 0], sizes = [1, 128], strides = [1, 1]} : vector<8x128xi32> to vector<1x128xi32>
    %11 = vector.broadcast %10 : vector<1x128xi32> to vector<128x128xi32>
    %12 = arith.cmpi eq, %4, %11 : vector<128x128xi32>
    %13 = vector.extract_strided_slice %8 {offsets = [0, 0], sizes = [1, 128], strides = [1, 1]} : vector<8x128xf32> to vector<1x128xf32>
    %cst_4 = arith.constant 0.000000e+00 : f32
    %14 = vector.shape_cast %13 : vector<1x128xf32> to vector<1x128xf32>
    %15 = vector.broadcast %14 : vector<1x128xf32> to vector<128x128xf32>
    %16 = vector.broadcast %cst_4 : f32 to vector<128x128xf32>
    %17 = arith.select %12, %15, %16 : vector<128x128xi1>, vector<128x128xf32>
    %18 = arith.addf %9, %17 : vector<128x128xf32>
    %19 = vector.extract_strided_slice %7 {offsets = [1, 0], sizes = [1, 128], strides = [1, 1]} : vector<8x128xi32> to vector<1x128xi32>
    %20 = vector.broadcast %19 : vector<1x128xi32> to vector<128x128xi32>
    %21 = arith.cmpi eq, %4, %20 : vector<128x128xi32>
    %22 = vector.extract_strided_slice %8 {offsets = [1, 0], sizes = [1, 128], strides = [1, 1]} : vector<8x128xf32> to vector<1x128xf32>
    %cst_5 = arith.constant 0.000000e+00 : f32
    %23 = vector.shape_cast %22 : vector<1x128xf32> to vector<1x128xf32>
    %24 = vector.broadcast %23 : vector<1x128xf32> to vector<128x128xf32>
    %25 = vector.broadcast %cst_5 : f32 to vector<128x128xf32>
    %26 = arith.select %21, %24, %25 : vector<128x128xi1>, vector<128x128xf32>
    %27 = arith.addf %18, %26 : vector<128x128xf32>
    %28 = vector.extract_strided_slice %7 {offsets = [2, 0], sizes = [1, 128], strides = [1, 1]} : vector<8x128xi32> to vector<1x128xi32>
    %29 = vector.broadcast %28 : vector<1x128xi32> to vector<128x128xi32>
    %30 = arith.cmpi eq, %4, %29 : vector<128x128xi32>
    %31 = vector.extract_strided_slice %8 {offsets = [2, 0], sizes = [1, 128], strides = [1, 1]} : vector<8x128xf32> to vector<1x128xf32>
    %cst_6 = arith.constant 0.000000e+00 : f32
    %32 = vector.shape_cast %31 : vector<1x128xf32> to vector<1x128xf32>
    %33 = vector.broadcast %32 : vector<1x128xf32> to vector<128x128xf32>
    %34 = vector.broadcast %cst_6 : f32 to vector<128x128xf32>
    %35 = arith.select %30, %33, %34 : vector<128x128xi1>, vector<128x128xf32>
    %36 = arith.addf %27, %35 : vector<128x128xf32>
    %37 = vector.extract_strided_slice %7 {offsets = [3, 0], sizes = [1, 128], strides = [1, 1]} : vector<8x128xi32> to vector<1x128xi32>
    %38 = vector.broadcast %37 : vector<1x128xi32> to vector<128x128xi32>
    %39 = arith.cmpi eq, %4, %38 : vector<128x128xi32>
    %40 = vector.extract_strided_slice %8 {offsets = [3, 0], sizes = [1, 128], strides = [1, 1]} : vector<8x128xf32> to vector<1x128xf32>
    %cst_7 = arith.constant 0.000000e+00 : f32
    %41 = vector.shape_cast %40 : vector<1x128xf32> to vector<1x128xf32>
    %42 = vector.broadcast %41 : vector<1x128xf32> to vector<128x128xf32>
    %43 = vector.broadcast %cst_7 : f32 to vector<128x128xf32>
    %44 = arith.select %39, %42, %43 : vector<128x128xi1>, vector<128x128xf32>
    %45 = arith.addf %36, %44 : vector<128x128xf32>
    %46 = vector.extract_strided_slice %7 {offsets = [4, 0], sizes = [1, 128], strides = [1, 1]} : vector<8x128xi32> to vector<1x128xi32>
    %47 = vector.broadcast %46 : vector<1x128xi32> to vector<128x128xi32>
    %48 = arith.cmpi eq, %4, %47 : vector<128x128xi32>
    %49 = vector.extract_strided_slice %8 {offsets = [4, 0], sizes = [1, 128], strides = [1, 1]} : vector<8x128xf32> to vector<1x128xf32>
    %cst_8 = arith.constant 0.000000e+00 : f32
    %50 = vector.shape_cast %49 : vector<1x128xf32> to vector<1x128xf32>
    %51 = vector.broadcast %50 : vector<1x128xf32> to vector<128x128xf32>
    %52 = vector.broadcast %cst_8 : f32 to vector<128x128xf32>
    %53 = arith.select %48, %51, %52 : vector<128x128xi1>, vector<128x128xf32>
    %54 = arith.addf %45, %53 : vector<128x128xf32>
    %55 = vector.extract_strided_slice %7 {offsets = [5, 0], sizes = [1, 128], strides = [1, 1]} : vector<8x128xi32> to vector<1x128xi32>
    %56 = vector.broadcast %55 : vector<1x128xi32> to vector<128x128xi32>
    %57 = arith.cmpi eq, %4, %56 : vector<128x128xi32>
    %58 = vector.extract_strided_slice %8 {offsets = [5, 0], sizes = [1, 128], strides = [1, 1]} : vector<8x128xf32> to vector<1x128xf32>
    %cst_9 = arith.constant 0.000000e+00 : f32
    %59 = vector.shape_cast %58 : vector<1x128xf32> to vector<1x128xf32>
    %60 = vector.broadcast %59 : vector<1x128xf32> to vector<128x128xf32>
    %61 = vector.broadcast %cst_9 : f32 to vector<128x128xf32>
    %62 = arith.select %57, %60, %61 : vector<128x128xi1>, vector<128x128xf32>
    %63 = arith.addf %54, %62 : vector<128x128xf32>
    %64 = vector.extract_strided_slice %7 {offsets = [6, 0], sizes = [1, 128], strides = [1, 1]} : vector<8x128xi32> to vector<1x128xi32>
    %65 = vector.broadcast %64 : vector<1x128xi32> to vector<128x128xi32>
    %66 = arith.cmpi eq, %4, %65 : vector<128x128xi32>
    %67 = vector.extract_strided_slice %8 {offsets = [6, 0], sizes = [1, 128], strides = [1, 1]} : vector<8x128xf32> to vector<1x128xf32>
    %cst_10 = arith.constant 0.000000e+00 : f32
    %68 = vector.shape_cast %67 : vector<1x128xf32> to vector<1x128xf32>
    %69 = vector.broadcast %68 : vector<1x128xf32> to vector<128x128xf32>
    %70 = vector.broadcast %cst_10 : f32 to vector<128x128xf32>
    %71 = arith.select %66, %69, %70 : vector<128x128xi1>, vector<128x128xf32>
    %72 = arith.addf %63, %71 : vector<128x128xf32>
    %73 = vector.extract_strided_slice %7 {offsets = [7, 0], sizes = [1, 128], strides = [1, 1]} : vector<8x128xi32> to vector<1x128xi32>
    %74 = vector.broadcast %73 : vector<1x128xi32> to vector<128x128xi32>
    %75 = arith.cmpi eq, %4, %74 : vector<128x128xi32>
    %76 = vector.extract_strided_slice %8 {offsets = [7, 0], sizes = [1, 128], strides = [1, 1]} : vector<8x128xf32> to vector<1x128xf32>
    %cst_11 = arith.constant 0.000000e+00 : f32
    %77 = vector.shape_cast %76 : vector<1x128xf32> to vector<1x128xf32>
    %78 = vector.broadcast %77 : vector<1x128xf32> to vector<128x128xf32>
    %79 = vector.broadcast %cst_11 : f32 to vector<128x128xf32>
    %80 = arith.select %75, %78, %79 : vector<128x128xi1>, vector<128x128xf32>
    %81 = arith.addf %72, %80 : vector<128x128xf32>
    %c0_12 = arith.constant 0 : index
    %c0_13 = arith.constant 0 : index
    %82 = vector.load %arg6[%c0_12, %c0_13] : memref<32x128xf32, #tpu.memory_space<vmem>>, vector<32x128xf32>
    %c0_14 = arith.constant 0 : index
    %c0_15 = arith.constant 0 : index
    %83 = vector.load %arg4[%c0_14, %c0_15] : memref<32x128xf32, #tpu.memory_space<vmem>>, vector<32x128xf32>
    %cst_16 = arith.constant dense<0.000000e+00> : vector<32x128xf32>
    %84 = tpu.matmul %83, %81, %cst_16 {dimension_numbers = #tpu.dot_dimension_numbers<[1], [0], [0], [1], [0, 0, 1, 1], [], []>} : vector<32x128xf32>, vector<128x128xf32>, vector<32x128xf32> -> vector<32x128xf32>
    %85 = arith.addf %82, %84 : vector<32x128xf32>
    %c0_17 = arith.constant 0 : index
    %c0_18 = arith.constant 0 : index
    %86 = vector.load %arg6[%c0_17, %c0_18] : memref<32x128xf32, #tpu.memory_space<vmem>>, vector<32x128xf32>
    tpu.vector_store %arg6[%c0_17, %c0_18], %85 {strides = array<i32>} : memref<32x128xf32, #tpu.memory_space<vmem>>, vector<32x128xf32>,
    %c0_i32_19 = arith.constant 0 : i32
    %87 = arith.cmpi eq, %arg1, %c0_i32_19 : i32
    %88 = arith.extui %87 : i1 to i32
    %c0_i32_20 = arith.constant 0 : i32
    %89 = arith.cmpi ne, %88, %c0_i32_20 : i32
    scf.if %89 {
      %c0_21 = arith.constant 0 : index
      %c0_22 = arith.constant 0 : index
      %90 = vector.load %arg6[%c0_21, %c0_22] : memref<32x128xf32, #tpu.memory_space<vmem>>, vector<32x128xf32>
      %c0_23 = arith.constant 0 : index
      %c0_24 = arith.constant 0 : index
      %91 = vector.load %arg5[%c0_23, %c0_24] : memref<32x128xf32, #tpu.memory_space<vmem>>, vector<32x128xf32>
      tpu.vector_store %arg5[%c0_23, %c0_24], %90 {strides = array<i32>} : memref<32x128xf32, #tpu.memory_space<vmem>>, vector<32x128xf32>,
    } else {
    }
    return
  }
  func.func @transform_0(%arg0: i32, %arg1: i32) -> (i32, i32) {
    %c0_i32 = arith.constant 0 : i32
    %c0_i32_0 = arith.constant 0 : i32
    return %c0_i32, %arg0 : i32, i32
  }
  func.func @transform_1(%arg0: i32, %arg1: i32) -> (i32, i32) {
    %c0_i32 = arith.constant 0 : i32
    %c0_i32_0 = arith.constant 0 : i32
    return %c0_i32, %arg0 : i32, i32
  }
  func.func @transform_2(%arg0: i32, %arg1: i32) -> (i32, i32) {
    %c0_i32 = arith.constant 0 : i32
    %c0_i32_0 = arith.constant 0 : i32
    return %c0_i32, %arg1 : i32, i32
  }
  func.func @transform_3(%arg0: i32, %arg1: i32) -> (i32, i32) {
    %c0_i32 = arith.constant 0 : i32
    %c0_i32_0 = arith.constant 0 : i32
    return %c0_i32, %arg0 : i32, i32
  }
}

</mosaic_0001>

<bundles_post_ra>
// kernel: tpu_custom_call.1
= control target key start
LH: loop header
LB: loop body
LE: loop exit
PB: predicated region body
PF: predicated region fallthrough
CT: control target
= control target key end

     0   :  { %s1925_s0 = inlined_call_operand.hbm [shape: s32[8,256], index: 0, kind: input, shape index: {}]   ;;  %s1926_s1 = inlined_call_operand.hbm [shape: f32[8,256], index: 1, kind: input, shape index: {}]   ;;  %s1927_s2 = inlined_call_operand.hbm [shape: f32[32,128], index: 2, kind: input, shape index: {}]   ;;  %s1928_s3 = inlined_call_operand.hbm [shape: f32[32,256], index: 3, kind: output, shape index: {}]  }
   0x1   :  { %1931 = sst [smem:[#allocation17_spill]] %s1927_s2 }
   0x2   :  { %8 = vsyncpa [#allocation4], 0 }
   0x3   :  { %10 = vsyncpa [#allocation4 + $0x1], 0 }
   0x4   :  { %11 = vsyncpa [#allocation7], 0 }
   0x5   :  { %13 = vsyncpa [#allocation7 + $0x1], 0 }
   0x6   :  { %14 = vsyncpa [#allocation5], 0 }
   0x7   :  { %16 = vsyncpa [#allocation5 + $0x1], 0  ;;  %s1235_s12 = smov 0   ;;  %s1237_s13 = smov 0  }
   0x8   :  { %s1239_s14 = smov 0   ;;  %s1241_s15 = smov 0  }
   0x9   :  { %s1243_s16 = smov 0   ;;  %s1245_s17 = smov 0  }
   0xa LB: > { %1932 = sst [smem:[#allocation14_spill]] %s1203_s16  ;;  %s1266_s18 = sadd.s32 4294967295, %s1207_s17   ;;  %s1207_s17 = sphi %s1245_s17, %s22_s17   ;;  %s1203_s16 = sphi %s1243_s16, %s1943_s16   ;;  %s1199_s15 = sphi %s1241_s15, %s1942_s15   ;;  %s1195_s14 = sphi %s1239_s14, %s1946_s14   ;;  %s1191_s13 = sphi %s1237_s13, %s1945_s13   ;;  %s1187_s12 = sphi %s1235_s12, %s1944_s12  }
   0xb   : > { %p880_p0 = scmp.ge.s32.totalorder %s1207_s17, 1  ;;  %p55_p1 = scmp.eq.s32.totalorder %s1266_s18, 0 }
   0xc   : > { %p143_p2 = scmp.lt.s32.totalorder %s1207_s17, 3  ;;  %s1933_s2 = sld [smem:[#allocation17_spill]] }
   0xd   : > { %s1209_s23 = smov [#allocation8]   ;;  %p882_p6 = scmp.ge.s32.totalorder %s1207_s17, 2 }
   0xe   : > { %p1274_p3 = pnand %p880_p0, %p143_p2  ;;  %s158_s24 = sshll.u32 %s1209_s23, 4  ;;  %s159_s24 = int_to_ptr.vmem [resolvable:$true] %s158_s24 }
   0xf   : > { %s1210_s25 = smov 128   ;;  %s1211_s26 = smov 8  }
  0x10   : > { %p954_p4 = pneg %p1274_p3  ;;  %s879_s27 = sadd.s32 4294967294, %s1207_s17  }
  0x11   : > { %s34_s28 = sadd.s32 1, %s1203_s16  ;;  %s41_s29 = sadd.s32 1, %s1195_s14 }
  0x12   : > { %s156_s21 = sshll.u32 %s1933_s2, 4  ;;  %p955_p5 = pnand %p954_p4, %p55_p1  ;;  %s157_s21 = int_to_ptr.hbm [resolvable:$true] %s156_s21 }
  0x13   : > { %p36_p7 = scmp.ge.s32.totalorder %s34_s28, 2  ;;  %p48_p8 = scmp.ne.s32.totalorder %s1195_s14, %s1191_s13 }
  0x14   : > { %957 = dma.hbm_to_vmem [thread:$0]  (!%p955_p5), %s157_s21, 512, %s159_s24, [#allocation7], %s1210_s25, %s1210_s25, %s1211_s26  }
  0x15   : > { %p49_p9 = scmp.eq.s32.totalorder %s1207_s17, 0  ;;  %p54_p10 = scmp.ne.s32.totalorder %s1191_s13, %s1187_s12 }
  0x16   : > { %s1948_s28 = smov (%p36_p7, %s34_s28), 0  ;;  %p130_p13 = scmp.eq.s32.totalorder %s1266_s18, 1 }
  0x17   : > { %1935 = sst [smem:[#allocation15_spill]] %s1948_s28  ;;  %p1293_p11 = por %p49_p9, %p48_p8 }
  0x18   : > { %p1299_p12 = por %p55_p1, %p54_p10  ;;  %s38_s5 = ssub.s32 %s1203_s16, %s1948_s28 }
  0x19   : > { %p39_p0 = scmp.eq.s32.totalorder %s38_s5, 0  ;;  %p136_p2 = scmp.eq.s32.totalorder %s879_s27, 1 }
  0x1a   : > { %p1306_p4 = por %p130_p13, %p48_p8  ;;  %p970_p5 = scmp.lt.s32.totalorder %s1207_s17, 2 }
  0x1b   : > { %s1312_s7 = scalar_select %p39_p0, %s1195_s14, %s41_s29  }
  0x1c   : > { %p1314_p7 = por %p136_p2, %p54_p10  ;;  %s172_s9 = sand.u32 1, %s1195_s14  }
  0x1d   : > { %1939 = sst [smem:[#allocation16_spill]] %s1312_s7  ;;  %s883_s10 = sshll.u32 %s172_s9, 3 }
  0x1e   : > { %s884_s11 = sshll.u32 %s1203_s16, 3  ;;  %s176_s23 = scalar_lea.vmem [#allocation3], %s883_s10 }
  0x1f   : > { %s180_s21 = scalar_lea.hbm %s1925_s0, %s884_s11  ;;  %s184_s24 = sshll.u32 %s176_s23, 4  ;;  %s185_s24 = int_to_ptr.vmem [resolvable:$true] %s184_s24 }
  0x20   : > { %s182_s25 = sshll.u32 %s180_s21, 4  ;;  %p959_p8 = pnand %p970_p5, %p1293_p11  ;;  %s183_s25 = int_to_ptr.hbm [resolvable:$true] %s182_s25 }
  0x21   : > { %s199_s29 = scalar_lea.hbm %s1926_s1, %s884_s11  ;;  %s191_s5 = sand.u32 1, %s1207_s17  }
  0x22   : > { %s173_s2 = scalar_lea.sflag [#allocation4], %s172_s9  ;;  %s201_s28 = sshll.u32 %s199_s29, 4  ;;  %s202_s28 = int_to_ptr.hbm [resolvable:$true] %s201_s28 }
  0x23   : > { %961 = dma.hbm_to_vmem [thread:$0]  (!%p959_p8), %s183_s25, 128, %s185_s24, %s173_s2  }
  0x24   : > { %s195_s16 = scalar_lea.vmem [#allocation6], %s883_s10  ;;  %s192_s19 = scalar_lea.sflag [#allocation7], %s191_s5 }
  0x25   : > { %s203_s7 = sshll.u32 %s195_s16, 4  ;;  %212 = sbr.rel (%p1274_p3) target bundleno = 297 (0x129), region = 32  ;;  %s204_s7 = int_to_ptr.vmem [resolvable:$true] %s203_s7 }
  0x26   : > { %964 = dma.hbm_to_vmem [thread:$0]  (!%p959_p8), %s202_s28, 128, %s204_s7, %s192_s19  }
  0x27   : > { %s1332_s30 = sand.u32 (!%p1274_p3), 1, %s1191_s13  }
  0x28   : > { %s888_s11 = sshll.u32 (!%p1274_p3), %s1332_s30, 3  ;;  %s215_s20 = scalar_lea.sflag (!%p1274_p3), [#allocation4], %s1332_s30 }
  0x29   : > { %s218_s9 = scalar_lea.vmem (!%p1274_p3), [#allocation3], %s888_s11 }
  0x2a   : > { %1170 = dma.done.wait (%p1299_p12), %s215_s20, 128  }
  0x2b   : > { %1172 = vsyncadd (%p1299_p12), %s215_s20, 4294967168  ;;  %s224_s2 = sand.u32 1, %s1266_s18   ;;  %s228_s22 = scalar_lea.vmem [#allocation6], %s888_s11 }
  0x2c   : > { %s225_s16 = scalar_lea.sflag [#allocation7], %s224_s2 }
  0x2d   : > { %1174 = dma.done.wait (%p1299_p12), %s225_s16, 128  }
  0x2e   : > { %1176 = vsyncadd (%p1299_p12), %s225_s16, 4294967168 }
  0x2f   : > { %1178 = dma.done.wait (%p55_p1), [#allocation7], 512  }
  0x30   : > { %1180 = vsyncadd (%p55_p1), [#allocation7], 4294966784  ;;  %v271_v0 = vlaneseq  ;;  %v288_v3 = vld [vmem:[%s218_s9] sm:$0xff]  ;;  %v291_v4 = vld [vmem:[%s228_s22] sm:$0xff]  ;;  %s891_s18 = sshll.u32 %s1332_s30, 5  ;;  %s893_s28 = sshll.u32 %s1199_s15, 3 }
  0x31   : > { %v1355_v6 = vperm.slane %v288_v3, 0  ;;  %v1357_v7 = vperm.slane %v291_v4, 0  ;;  %v1359_v8 = vperm.slane %v288_v3, 1  ;;  %v1361_v9 = vperm.slane %v291_v4, 1  ;;  %s759_s10 = scalar_lea.hbm %s1928_s3, %s893_s28  ;;  %s261_s21 = scalar_lea.vmem [#allocation9], %s891_s18 }
  0x32   : > { %v1349_v1 = vshrl.u32 %v271_v0, 7  ;;  %v1363_v10 = vperm.slane %v288_v3, 2  ;;  %v1365_v11 = vperm.slane %v291_v4, 2  ;;  %v1367_v12 = vperm.slane %v288_v3, 3  ;;  %s760_s23 = sshll.u32 %s261_s21, 4  ;;  %s762_s24 = sshll.u32 %s759_s10, 4  ;;  %s761_s23 = int_to_ptr.vmem [resolvable:$true] %s760_s23  ;;  %s763_s24 = int_to_ptr.hbm [resolvable:$true] %s762_s24 }
  0x33   : > { %v1369_v13 = vperm.slane %v291_v4, 3  ;;  %v1373_v14 = vperm.slane %v288_v3, 4  ;;  %v1375_v15 = vperm.slane %v291_v4, 4  ;;  %v1387_v22 = vperm.slane %v288_v3, 5  ;;  %s749_s25 = scalar_lea.sflag [#allocation5], %s1332_s30  ;;  %s1131_s15 = sshra.s32 %s763_s24, 4  ;;  %s1132_s15 = int_to_ptr.hbm [resolvable:$true] %s1131_s15 }
  0x34   : > { %v287_v2 = vadd.s32 120, %v1349_v1  ;;  %v1353_v5 = vadd.s32 112, %v1349_v1  ;;  %v1384_v20 = vadd.s32 104, %v1349_v1  ;;  %v1389_v23 = vperm.slane %v291_v4, 5  ;;  %s1133_s26 = scalar_lea.hbm %s1132_s15, 32  ;;  %s1137_s5 = scalar_lea.hbm %s1928_s3, 64 }
  0x35   : > { %v1391_v24 = vperm.slane %v288_v3, 6  ;;  %v1394_v27 = vperm.slane %v288_v3, 7  ;;  %v1397_v28 = vadd.s32 96, %v1349_v1  ;;  %v1400_v29 = vperm.slane %v291_v4, 6  ;;  %p1134_p1 = scmp.ne.s32.totalorder %s1132_s15, %s1133_s26  ;;  %p1138_p10 = scmp.lt.s32.totalorder %s1132_s15, %s1928_s3 }
  0x36   : > { %vm308_vm0 = vcmp.eq.s32.totalorder %v287_v2, %v1355_v6  ;;  %vm358_vm1 = vcmp.eq.s32.totalorder %v287_v2, %v1359_v8  ;;  %vm408_vm2 = vcmp.eq.s32.totalorder %v287_v2, %v1363_v10  ;;  %vm458_vm3 = vcmp.eq.s32.totalorder %v287_v2, %v1367_v12  ;;  %p1139_p11 = scmp.lt.s32.totalorder %s1137_s5, %s1133_s26 }
  0x37   : > { %v325_v16 = vsel %vm308_vm0, %v1357_v7, 0.0  ;;  %v375_v17 = vsel %vm358_vm1, %v1361_v9, 0.0  ;;  %v425_v19 = vsel %vm408_vm2, %v1365_v11, 0.0  ;;  %vm508_vm4 = vcmp.eq.s32.totalorder %v287_v2, %v1373_v14  ;;  %p1135_p3 = pnand %p1134_p1, %p1306_p4 }
  0x38   : > { %v391_v18 = vadd.f32 %v375_v17, %v325_v16  ;;  %v475_v21 = vsel %vm458_vm3, %v1369_v13, 0.0  ;;  %v525_v26 = vsel %vm508_vm4, %v1375_v15, 0.0  ;;  %vm558_vm5 = vcmp.eq.s32.totalorder %v287_v2, %v1387_v22  ;;  %p1140_p12 = por %p1139_p11, %p1138_p10 }
  0x39   : > { %vm307_vm6 = vcmp.eq.s32.totalorder %v1353_v5, %v1355_v6  ;;  %vm357_vm7 = vcmp.eq.s32.totalorder %v1353_v5, %v1359_v8  ;;  %v575_v31 = vsel %vm558_vm5, %v1389_v23, 0.0  ;;  %vm608_vm8 = vcmp.eq.s32.totalorder %v287_v2, %v1391_v24  ;;  %p1136_p9 = pneg %p1135_p3 }
  0x3a   : > { %v441_v25 = vadd.f32 %v425_v19, %v391_v18  ;;  %v1408_v32 = vperm.slane %v291_v4, 7  ;;  %vm658_vm9 = vcmp.eq.s32.totalorder %v287_v2, %v1394_v27  ;;  %v324_v33 = vsel %vm307_vm6, %v1357_v7, 0.0 }
  0x3b   : > { %v374_v34 = vsel %vm357_vm7, %v1361_v9, 0.0  ;;  %vm407_vm10 = vcmp.eq.s32.totalorder %v1353_v5, %v1363_v10  ;;  %vm457_vm11 = vcmp.eq.s32.totalorder %v1353_v5, %v1367_v12  ;;  %v625_v38 = vsel %vm608_vm8, %v1400_v29, 0.0  ;;  %p1141_p13 = pnand %p1140_p12, %p1136_p9 }
  0x3c   : > { %v491_v30 = vadd.f32 %v475_v21, %v441_v25  ;;  %v390_v36 = vadd.f32 %v374_v34, %v324_v33  ;;  %v424_v37 = vsel %vm407_vm10, %v1365_v11, 0.0  ;;  %v474_v39 = vsel %vm457_vm11, %v1369_v13, 0.0 }
  0x3d   : > { %vm507_vm12 = vcmp.eq.s32.totalorder %v1353_v5, %v1373_v14  ;;  %vm557_vm13 = vcmp.eq.s32.totalorder %v1353_v5, %v1387_v22  ;;  %v675_v41 = vsel %vm658_vm9, %v1408_v32, 0.0  ;;  %vm607_vm14 = vcmp.eq.s32.totalorder %v1353_v5, %v1391_v24 }
  0x3e   : > { %v541_v35 = vadd.f32 %v525_v26, %v491_v30  ;;  %v440_v42 = vadd.f32 %v424_v37, %v390_v36  ;;  %v524_v43 = vsel %vm507_vm12, %v1375_v15, 0.0  ;;  %v574_v44 = vsel %vm557_vm13, %v1389_v23, 0.0 }
  0x3f   : > { %vm306_vm15 = vcmp.eq.s32.totalorder %v1384_v20, %v1355_v6  ;;  %vm356_vm0 = vcmp.eq.s32.totalorder %v1384_v20, %v1359_v8  ;;  %vm657_vm1 = vcmp.eq.s32.totalorder %v1353_v5, %v1394_v27  ;;  %vm406_vm2 = vcmp.eq.s32.totalorder %v1384_v20, %v1363_v10 }
  0x40   : > { %v591_v40 = vadd.f32 %v575_v31, %v541_v35  ;;  %v490_v46 = vadd.f32 %v474_v39, %v440_v42  ;;  %v323_v47 = vsel %vm306_vm15, %v1357_v7, 0.0  ;;  %v373_v48 = vsel %vm356_vm0, %v1361_v9, 0.0 }
  0x41   : > { %vm456_vm3 = vcmp.eq.s32.totalorder %v1384_v20, %v1367_v12  ;;  %vm506_vm4 = vcmp.eq.s32.totalorder %v1384_v20, %v1373_v14  ;;  %v389_v51 = vadd.f32 %v373_v48, %v323_v47  ;;  %v423_v52 = vsel %vm406_vm2, %v1365_v11, 0.0 }
  0x42   : > { %v641_v45 = vadd.f32 %v625_v38, %v591_v40  ;;  %v540_v50 = vadd.f32 %v524_v43, %v490_v46  ;;  %v624_v53 = vsel %vm607_vm14, %v1400_v29, 0.0  ;;  %v473_v54 = vsel %vm456_vm3, %v1369_v13, 0.0 }
  0x43   : > { %vm556_vm5 = vcmp.eq.s32.totalorder %v1384_v20, %v1387_v22  ;;  %v1452_v55 = vadd.s32 88, %v1349_v1  ;;  %v674_v57 = vsel %vm657_vm1, %v1408_v32, 0.0  ;;  %v439_v58 = vadd.f32 %v423_v52, %v389_v51 }
  0x44   : > { %v691_v49 = vadd.f32 %v675_v41, %v641_v45  ;;  %v590_v56 = vadd.f32 %v574_v44, %v540_v50  ;;  %v523_v59 = vsel %vm506_vm4, %v1375_v15, 0.0  ;;  %v573_v60 = vsel %vm556_vm5, %v1389_v23, 0.0 }
  0x45   : > { %vm606_vm6 = vcmp.eq.s32.totalorder %v1384_v20, %v1391_v24  ;;  %vm305_vm7 = vcmp.eq.s32.totalorder %v1397_v28, %v1355_v6  ;;  %vm355_vm8 = vcmp.eq.s32.totalorder %v1397_v28, %v1359_v8  ;;  %v489_v62 = vadd.f32 %v473_v54, %v439_v58 }
  0x46   : > { %897 = vmatpush.msra.mxu2 %v691_v49  ;;  %898 = vmatpush.msra.mxu3 %v691_v49  ;;  %v640_v61 = vadd.f32 %v624_v53, %v590_v56  ;;  %vm656_vm9 = vcmp.eq.s32.totalorder %v1384_v20, %v1394_v27  ;;  %v322_v63 = vsel %vm305_vm7, %v1357_v7, 0.0  ;;  %v372_v0 = vsel %vm355_vm8, %v1361_v9, 0.0 }
  0x47   : > { %700 = vmatpush.msra.mxu0 %v691_v49  ;;  %896 = vmatpush.msra.mxu1 %v691_v49  ;;  %vm405_vm10 = vcmp.eq.s32.totalorder %v1397_v28, %v1363_v10  ;;  %vm455_vm11 = vcmp.eq.s32.totalorder %v1397_v28, %v1367_v12  ;;  %vm505_vm12 = vcmp.eq.s32.totalorder %v1397_v28, %v1373_v14  ;;  %v623_v16 = vsel %vm606_vm6, %v1400_v29, 0.0 }
  0x48   : > { %v690_v2 = vadd.f32 %v674_v57, %v640_v61  ;;  %v539_v3 = vadd.f32 %v523_v59, %v489_v62  ;;  %v388_v4 = vadd.f32 %v372_v0, %v322_v63  ;;  %v422_v5 = vsel %vm405_vm10, %v1365_v11, 0.0 }
  0x49   : > { %v472_v17 = vsel %vm455_vm11, %v1369_v13, 0.0  ;;  %vm555_vm13 = vcmp.eq.s32.totalorder %v1397_v28, %v1387_v22  ;;  %v1485_v18 = vadd.s32 80, %v1349_v1  ;;  %v673_v21 = vsel %vm656_vm9, %v1408_v32, 0.0 }
  0x4a   : > { %900 = vmatpush.msra.mxu2 %v690_v2  ;;  %901 = vmatpush.msra.mxu3 %v690_v2  ;;  %v589_v19 = vadd.f32 %v573_v60, %v539_v3  ;;  %v438_v25 = vadd.f32 %v422_v5, %v388_v4  ;;  %v522_v26 = vsel %vm505_vm12, %v1375_v15, 0.0  ;;  %v572_v30 = vsel %vm555_vm13, %v1389_v23, 0.0 }
  0x4b   : > { %vm605_vm14 = vcmp.eq.s32.totalorder %v1397_v28, %v1391_v24  ;;  %701 = vmatpush.msra.mxu0 %v690_v2  ;;  %899 = vmatpush.msra.mxu1 %v690_v2  ;;  %vm304_vm15 = vcmp.eq.s32.totalorder %v1452_v55, %v1355_v6  ;;  %vm354_vm0 = vcmp.eq.s32.totalorder %v1452_v55, %v1359_v8  ;;  %v1518_v41 = vadd.s32 72, %v1349_v1 }
  0x4c   : > { %v639_v31 = vadd.f32 %v623_v16, %v589_v19  ;;  %v488_v33 = vadd.f32 %v472_v17, %v438_v25  ;;  %vm655_vm1 = vcmp.eq.s32.totalorder %v1397_v28, %v1394_v27  ;;  %v321_v20 = vsel %vm304_vm15, %v1357_v7, 0.0 }
  0x4d   : > { %v371_v34 = vsel %vm354_vm0, %v1361_v9, 0.0  ;;  %vm404_vm2 = vcmp.eq.s32.totalorder %v1452_v55, %v1363_v10  ;;  %vm454_vm3 = vcmp.eq.s32.totalorder %v1452_v55, %v1367_v12  ;;  %vm504_vm4 = vcmp.eq.s32.totalorder %v1452_v55, %v1373_v14 }
  0x4e   : > { %v689_v35 = vadd.f32 %v673_v21, %v639_v31  ;;  %v538_v36 = vadd.f32 %v522_v26, %v488_v33  ;;  %v387_v37 = vadd.f32 %v371_v34, %v321_v20  ;;  %v421_v38 = vsel %vm404_vm2, %v1365_v11, 0.0 }
  0x4f   : > { %v622_v39 = vsel %vm605_vm14, %v1400_v29, 0.0  ;;  %v471_v40 = vsel %vm454_vm3, %v1369_v13, 0.0  ;;  %vm554_vm5 = vcmp.eq.s32.totalorder %v1452_v55, %v1387_v22  ;;  %v672_v43 = vsel %vm655_vm1, %v1408_v32, 0.0 }
  0x50   : > { %903 = vmatpush.msra.mxu2 %v689_v35  ;;  %904 = vmatpush.msra.mxu3 %v689_v35  ;;  %v588_v42 = vadd.f32 %v572_v30, %v538_v36  ;;  %v437_v44 = vadd.f32 %v421_v38, %v387_v37  ;;  %v521_v45 = vsel %vm504_vm4, %v1375_v15, 0.0  ;;  %v571_v46 = vsel %vm554_vm5, %v1389_v23, 0.0 }
  0x51   : > { %vm604_vm6 = vcmp.eq.s32.totalorder %v1452_v55, %v1391_v24  ;;  %702 = vmatpush.msra.mxu0 %v689_v35  ;;  %902 = vmatpush.msra.mxu1 %v689_v35  ;;  %vm303_vm7 = vcmp.eq.s32.totalorder %v1485_v18, %v1355_v6  ;;  %vm353_vm8 = vcmp.eq.s32.totalorder %v1485_v18, %v1359_v8  ;;  %v1551_v57 = vadd.s32 64, %v1349_v1 }
  0x52   : > { %v638_v47 = vadd.f32 %v622_v39, %v588_v42  ;;  %v487_v48 = vadd.f32 %v471_v40, %v437_v44  ;;  %vm654_vm9 = vcmp.eq.s32.totalorder %v1452_v55, %v1394_v27  ;;  %v320_v28 = vsel %vm303_vm7, %v1357_v7, 0.0 }
  0x53   : > { %v370_v49 = vsel %vm353_vm8, %v1361_v9, 0.0  ;;  %vm403_vm10 = vcmp.eq.s32.totalorder %v1485_v18, %v1363_v10  ;;  %vm453_vm11 = vcmp.eq.s32.totalorder %v1485_v18, %v1367_v12  ;;  %vm503_vm12 = vcmp.eq.s32.totalorder %v1485_v18, %v1373_v14 }
  0x54   : > { %v688_v50 = vadd.f32 %v672_v43, %v638_v47  ;;  %v537_v51 = vadd.f32 %v521_v45, %v487_v48  ;;  %v386_v52 = vadd.f32 %v370_v49, %v320_v28  ;;  %v420_v53 = vsel %vm403_vm10, %v1365_v11, 0.0 }
  0x55   : > { %v621_v54 = vsel %vm604_vm6, %v1400_v29, 0.0  ;;  %v470_v56 = vsel %vm453_vm11, %v1369_v13, 0.0  ;;  %vm553_vm13 = vcmp.eq.s32.totalorder %v1485_v18, %v1387_v22  ;;  %v671_v59 = vsel %vm654_vm9, %v1408_v32, 0.0 }
  0x56   : > { %906 = vmatpush.msra.mxu2 %v688_v50  ;;  %907 = vmatpush.msra.mxu3 %v688_v50  ;;  %v587_v58 = vadd.f32 %v571_v46, %v537_v51  ;;  %v436_v60 = vadd.f32 %v420_v53, %v386_v52  ;;  %v520_v61 = vsel %vm503_vm12, %v1375_v15, 0.0  ;;  %v570_v62 = vsel %vm553_vm13, %v1389_v23, 0.0 }
  0x57   : > { %vm603_vm14 = vcmp.eq.s32.totalorder %v1485_v18, %v1391_v24  ;;  %703 = vmatpush.msra.mxu0 %v688_v50  ;;  %905 = vmatpush.msra.mxu1 %v688_v50  ;;  %vm302_vm15 = vcmp.eq.s32.totalorder %v1518_v41, %v1355_v6  ;;  %vm352_vm0 = vcmp.eq.s32.totalorder %v1518_v41, %v1359_v8  ;;  %v1584_v21 = vadd.s32 56, %v1349_v1 }
  0x58   : > { %v637_v63 = vadd.f32 %v621_v54, %v587_v58  ;;  %v486_v0 = vadd.f32 %v470_v56, %v436_v60  ;;  %vm653_vm1 = vcmp.eq.s32.totalorder %v1485_v18, %v1394_v27  ;;  %v319_v55 = vsel %vm302_vm15, %v1357_v7, 0.0 }
  0x59   : > { %v369_v2 = vsel %vm352_vm0, %v1361_v9, 0.0  ;;  %vm402_vm2 = vcmp.eq.s32.totalorder %v1518_v41, %v1363_v10  ;;  %vm452_vm3 = vcmp.eq.s32.totalorder %v1518_v41, %v1367_v12  ;;  %vm502_vm4 = vcmp.eq.s32.totalorder %v1518_v41, %v1373_v14 }
  0x5a   : > { %v687_v3 = vadd.f32 %v671_v59, %v637_v63  ;;  %v536_v4 = vadd.f32 %v520_v61, %v486_v0  ;;  %v385_v5 = vadd.f32 %v369_v2, %v319_v55  ;;  %v419_v16 = vsel %vm402_vm2, %v1365_v11, 0.0 }
  0x5b   : > { %v620_v17 = vsel %vm603_vm14, %v1400_v29, 0.0  ;;  %v469_v19 = vsel %vm452_vm3, %v1369_v13, 0.0  ;;  %vm552_vm5 = vcmp.eq.s32.totalorder %v1518_v41, %v1387_v22  ;;  %v670_v26 = vsel %vm653_vm1, %v1408_v32, 0.0 }
  0x5c   : > { %909 = vmatpush.msra.mxu2 %v687_v3  ;;  %910 = vmatpush.msra.mxu3 %v687_v3  ;;  %v586_v25 = vadd.f32 %v570_v62, %v536_v4  ;;  %v435_v30 = vadd.f32 %v419_v16, %v385_v5  ;;  %v519_v31 = vsel %vm502_vm4, %v1375_v15, 0.0  ;;  %v569_v33 = vsel %vm552_vm5, %v1389_v23, 0.0 }
  0x5d   : > { %vm602_vm6 = vcmp.eq.s32.totalorder %v1518_v41, %v1391_v24  ;;  %704 = vmatpush.msra.mxu0 %v687_v3  ;;  %908 = vmatpush.msra.mxu1 %v687_v3  ;;  %vm301_vm7 = vcmp.eq.s32.totalorder %v1551_v57, %v1355_v6  ;;  %vm351_vm8 = vcmp.eq.s32.totalorder %v1551_v57, %v1359_v8  ;;  %v1617_v43 = vadd.s32 48, %v1349_v1 }
  0x5e   : > { %v636_v20 = vadd.f32 %v620_v17, %v586_v25  ;;  %v485_v34 = vadd.f32 %v469_v19, %v435_v30  ;;  %vm652_vm9 = vcmp.eq.s32.totalorder %v1518_v41, %v1394_v27  ;;  %v318_v18 = vsel %vm301_vm7, %v1357_v7, 0.0 }
  0x5f   : > { %v368_v35 = vsel %vm351_vm8, %v1361_v9, 0.0  ;;  %vm401_vm10 = vcmp.eq.s32.totalorder %v1551_v57, %v1363_v10  ;;  %vm451_vm11 = vcmp.eq.s32.totalorder %v1551_v57, %v1367_v12  ;;  %vm501_vm12 = vcmp.eq.s32.totalorder %v1551_v57, %v1373_v14 }
  0x60   : > { %v686_v36 = vadd.f32 %v670_v26, %v636_v20  ;;  %v535_v37 = vadd.f32 %v519_v31, %v485_v34  ;;  %v384_v38 = vadd.f32 %v368_v35, %v318_v18  ;;  %v418_v39 = vsel %vm401_vm10, %v1365_v11, 0.0 }
  0x61   : > { %v619_v40 = vsel %vm602_vm6, %v1400_v29, 0.0  ;;  %v468_v42 = vsel %vm451_vm11, %v1369_v13, 0.0  ;;  %vm551_vm13 = vcmp.eq.s32.totalorder %v1551_v57, %v1387_v22  ;;  %v669_v45 = vsel %vm652_vm9, %v1408_v32, 0.0 }
  0x62   : > { %912 = vmatpush.msra.mxu2 %v686_v36  ;;  %913 = vmatpush.msra.mxu3 %v686_v36  ;;  %v585_v44 = vadd.f32 %v569_v33, %v535_v37  ;;  %v434_v46 = vadd.f32 %v418_v39, %v384_v38  ;;  %v518_v47 = vsel %vm501_vm12, %v1375_v15, 0.0  ;;  %v568_v48 = vsel %vm551_vm13, %v1389_v23, 0.0 }
  0x63   : > { %vm601_vm14 = vcmp.eq.s32.totalorder %v1551_v57, %v1391_v24  ;;  %705 = vmatpush.msra.mxu0 %v686_v36  ;;  %911 = vmatpush.msra.mxu1 %v686_v36  ;;  %vm300_vm15 = vcmp.eq.s32.totalorder %v1584_v21, %v1355_v6  ;;  %vm350_vm0 = vcmp.eq.s32.totalorder %v1584_v21, %v1359_v8  ;;  %v1650_v59 = vadd.s32 40, %v1349_v1 }
  0x64   : > { %v635_v28 = vadd.f32 %v619_v40, %v585_v44  ;;  %v484_v49 = vadd.f32 %v468_v42, %v434_v46  ;;  %vm651_vm1 = vcmp.eq.s32.totalorder %v1551_v57, %v1394_v27  ;;  %v317_v41 = vsel %vm300_vm15, %v1357_v7, 0.0 }
  0x65   : > { %v367_v50 = vsel %vm350_vm0, %v1361_v9, 0.0  ;;  %vm400_vm2 = vcmp.eq.s32.totalorder %v1584_v21, %v1363_v10  ;;  %vm450_vm3 = vcmp.eq.s32.totalorder %v1584_v21, %v1367_v12  ;;  %vm500_vm4 = vcmp.eq.s32.totalorder %v1584_v21, %v1373_v14 }
  0x66   : > { %v685_v51 = vadd.f32 %v669_v45, %v635_v28  ;;  %v534_v52 = vadd.f32 %v518_v47, %v484_v49  ;;  %v383_v53 = vadd.f32 %v367_v50, %v317_v41  ;;  %v417_v54 = vsel %vm400_vm2, %v1365_v11, 0.0 }
  0x67   : > { %v618_v56 = vsel %vm601_vm14, %v1400_v29, 0.0  ;;  %v467_v58 = vsel %vm450_vm3, %v1369_v13, 0.0  ;;  %vm550_vm5 = vcmp.eq.s32.totalorder %v1584_v21, %v1387_v22  ;;  %v668_v61 = vsel %vm651_vm1, %v1408_v32, 0.0 }
  0x68   : > { %915 = vmatpush.msra.mxu2 %v685_v51  ;;  %916 = vmatpush.msra.mxu3 %v685_v51  ;;  %v584_v60 = vadd.f32 %v568_v48, %v534_v52  ;;  %v433_v62 = vadd.f32 %v417_v54, %v383_v53  ;;  %v517_v63 = vsel %vm500_vm4, %v1375_v15, 0.0  ;;  %v567_v0 = vsel %vm550_vm5, %v1389_v23, 0.0 }
  0x69   : > { %vm600_vm6 = vcmp.eq.s32.totalorder %v1584_v21, %v1391_v24  ;;  %706 = vmatpush.msra.mxu0 %v685_v51  ;;  %914 = vmatpush.msra.mxu1 %v685_v51  ;;  %vm299_vm7 = vcmp.eq.s32.totalorder %v1617_v43, %v1355_v6  ;;  %vm349_vm8 = vcmp.eq.s32.totalorder %v1617_v43, %v1359_v8  ;;  %v1683_v26 = vadd.s32 32, %v1349_v1 }
  0x6a   : > { %v634_v55 = vadd.f32 %v618_v56, %v584_v60  ;;  %v483_v2 = vadd.f32 %v467_v58, %v433_v62  ;;  %vm650_vm9 = vcmp.eq.s32.totalorder %v1584_v21, %v1394_v27  ;;  %v316_v57 = vsel %vm299_vm7, %v1357_v7, 0.0 }
  0x6b   : > { %v366_v3 = vsel %vm349_vm8, %v1361_v9, 0.0  ;;  %vm399_vm10 = vcmp.eq.s32.totalorder %v1617_v43, %v1363_v10  ;;  %vm449_vm11 = vcmp.eq.s32.totalorder %v1617_v43, %v1367_v12  ;;  %vm499_vm12 = vcmp.eq.s32.totalorder %v1617_v43, %v1373_v14 }
  0x6c   : > { %v684_v4 = vadd.f32 %v668_v61, %v634_v55  ;;  %v533_v5 = vadd.f32 %v517_v63, %v483_v2  ;;  %v382_v16 = vadd.f32 %v366_v3, %v316_v57  ;;  %v416_v17 = vsel %vm399_vm10, %v1365_v11, 0.0 }
  0x6d   : > { %v617_v19 = vsel %vm600_vm6, %v1400_v29, 0.0  ;;  %v466_v25 = vsel %vm449_vm11, %v1369_v13, 0.0  ;;  %vm549_vm13 = vcmp.eq.s32.totalorder %v1617_v43, %v1387_v22  ;;  %v667_v31 = vsel %vm650_vm9, %v1408_v32, 0.0 }
  0x6e   : > { %918 = vmatpush.msra.mxu2 %v684_v4  ;;  %919 = vmatpush.msra.mxu3 %v684_v4  ;;  %v583_v30 = vadd.f32 %v567_v0, %v533_v5  ;;  %v432_v33 = vadd.f32 %v416_v17, %v382_v16  ;;  %v516_v20 = vsel %vm499_vm12, %v1375_v15, 0.0  ;;  %v566_v34 = vsel %vm549_vm13, %v1389_v23, 0.0 }
  0x6f   : > { %vm599_vm14 = vcmp.eq.s32.totalorder %v1617_v43, %v1391_v24  ;;  %707 = vmatpush.msra.mxu0 %v684_v4  ;;  %917 = vmatpush.msra.mxu1 %v684_v4  ;;  %vm298_vm15 = vcmp.eq.s32.totalorder %v1650_v59, %v1355_v6  ;;  %vm348_vm0 = vcmp.eq.s32.totalorder %v1650_v59, %v1359_v8  ;;  %v1716_v45 = vadd.s32 24, %v1349_v1 }
  0x70   : > { %v633_v18 = vadd.f32 %v617_v19, %v583_v30  ;;  %v482_v35 = vadd.f32 %v466_v25, %v432_v33  ;;  %vm649_vm1 = vcmp.eq.s32.totalorder %v1617_v43, %v1394_v27  ;;  %v315_v21 = vsel %vm298_vm15, %v1357_v7, 0.0 }
  0x71   : > { %v365_v36 = vsel %vm348_vm0, %v1361_v9, 0.0  ;;  %vm398_vm2 = vcmp.eq.s32.totalorder %v1650_v59, %v1363_v10  ;;  %vm448_vm3 = vcmp.eq.s32.totalorder %v1650_v59, %v1367_v12  ;;  %vm498_vm4 = vcmp.eq.s32.totalorder %v1650_v59, %v1373_v14 }
  0x72   : > { %v683_v37 = vadd.f32 %v667_v31, %v633_v18  ;;  %v532_v38 = vadd.f32 %v516_v20, %v482_v35  ;;  %v381_v39 = vadd.f32 %v365_v36, %v315_v21  ;;  %v415_v40 = vsel %vm398_vm2, %v1365_v11, 0.0 }
  0x73   : > { %v616_v42 = vsel %vm599_vm14, %v1400_v29, 0.0  ;;  %v465_v44 = vsel %vm448_vm3, %v1369_v13, 0.0  ;;  %vm548_vm5 = vcmp.eq.s32.totalorder %v1650_v59, %v1387_v22  ;;  %v666_v47 = vsel %vm649_vm1, %v1408_v32, 0.0 }
  0x74   : > { %921 = vmatpush.msra.mxu2 %v683_v37  ;;  %922 = vmatpush.msra.mxu3 %v683_v37  ;;  %v582_v46 = vadd.f32 %v566_v34, %v532_v38  ;;  %v431_v48 = vadd.f32 %v415_v40, %v381_v39  ;;  %v515_v28 = vsel %vm498_vm4, %v1375_v15, 0.0  ;;  %v565_v49 = vsel %vm548_vm5, %v1389_v23, 0.0 }
  0x75   : > { %vm598_vm6 = vcmp.eq.s32.totalorder %v1650_v59, %v1391_v24  ;;  %708 = vmatpush.msra.mxu0 %v683_v37  ;;  %920 = vmatpush.msra.mxu1 %v683_v37  ;;  %vm297_vm7 = vcmp.eq.s32.totalorder %v1683_v26, %v1355_v6  ;;  %vm347_vm8 = vcmp.eq.s32.totalorder %v1683_v26, %v1359_v8  ;;  %v1749_v61 = vadd.s32 16, %v1349_v1 }
  0x76   : > { %v632_v41 = vadd.f32 %v616_v42, %v582_v46  ;;  %v481_v50 = vadd.f32 %v465_v44, %v431_v48  ;;  %vm648_vm9 = vcmp.eq.s32.totalorder %v1650_v59, %v1394_v27  ;;  %v314_v43 = vsel %vm297_vm7, %v1357_v7, 0.0 }
  0x77   : > { %v364_v51 = vsel %vm347_vm8, %v1361_v9, 0.0  ;;  %vm397_vm10 = vcmp.eq.s32.totalorder %v1683_v26, %v1363_v10  ;;  %vm447_vm11 = vcmp.eq.s32.totalorder %v1683_v26, %v1367_v12  ;;  %vm497_vm12 = vcmp.eq.s32.totalorder %v1683_v26, %v1373_v14 }
  0x78   : > { %v682_v52 = vadd.f32 %v666_v47, %v632_v41  ;;  %v531_v53 = vadd.f32 %v515_v28, %v481_v50  ;;  %v380_v54 = vadd.f32 %v364_v51, %v314_v43  ;;  %v414_v56 = vsel %vm397_vm10, %v1365_v11, 0.0 }
  0x79   : > { %v615_v58 = vsel %vm598_vm6, %v1400_v29, 0.0  ;;  %v464_v60 = vsel %vm447_vm11, %v1369_v13, 0.0  ;;  %vm547_vm13 = vcmp.eq.s32.totalorder %v1683_v26, %v1387_v22  ;;  %v665_v63 = vsel %vm648_vm9, %v1408_v32, 0.0 }
  0x7a   : > { %924 = vmatpush.msra.mxu2 %v682_v52  ;;  %925 = vmatpush.msra.mxu3 %v682_v52  ;;  %v581_v62 = vadd.f32 %v565_v49, %v531_v53  ;;  %v430_v0 = vadd.f32 %v414_v56, %v380_v54  ;;  %v514_v55 = vsel %vm497_vm12, %v1375_v15, 0.0  ;;  %v564_v2 = vsel %vm547_vm13, %v1389_v23, 0.0 }
  0x7b   : > { %vm597_vm14 = vcmp.eq.s32.totalorder %v1683_v26, %v1391_v24  ;;  %709 = vmatpush.msra.mxu0 %v682_v52  ;;  %923 = vmatpush.msra.mxu1 %v682_v52  ;;  %vm296_vm15 = vcmp.eq.s32.totalorder %v1716_v45, %v1355_v6  ;;  %vm346_vm0 = vcmp.eq.s32.totalorder %v1716_v45, %v1359_v8  ;;  %v1782_v31 = vadd.s32 8, %v1349_v1 }
  0x7c   : > { %v631_v57 = vadd.f32 %v615_v58, %v581_v62  ;;  %v480_v3 = vadd.f32 %v464_v60, %v430_v0  ;;  %vm647_vm1 = vcmp.eq.s32.totalorder %v1683_v26, %v1394_v27  ;;  %v313_v59 = vsel %vm296_vm15, %v1357_v7, 0.0 }
  0x7d   : > { %v363_v4 = vsel %vm346_vm0, %v1361_v9, 0.0  ;;  %vm396_vm2 = vcmp.eq.s32.totalorder %v1716_v45, %v1363_v10  ;;  %vm446_vm3 = vcmp.eq.s32.totalorder %v1716_v45, %v1367_v12  ;;  %vm496_vm4 = vcmp.eq.s32.totalorder %v1716_v45, %v1373_v14 }
  0x7e   : > { %v681_v5 = vadd.f32 %v665_v63, %v631_v57  ;;  %v530_v16 = vadd.f32 %v514_v55, %v480_v3  ;;  %v379_v17 = vadd.f32 %v363_v4, %v313_v59  ;;  %v413_v19 = vsel %vm396_vm2, %v1365_v11, 0.0 }
  0x7f   : > { %v614_v25 = vsel %vm597_vm14, %v1400_v29, 0.0  ;;  %v463_v30 = vsel %vm446_vm3, %v1369_v13, 0.0  ;;  %vm546_vm5 = vcmp.eq.s32.totalorder %v1716_v45, %v1387_v22  ;;  %v664_v20 = vsel %vm647_vm1, %v1408_v32, 0.0 }
  0x80   : > { %927 = vmatpush.msra.mxu2 %v681_v5  ;;  %928 = vmatpush.msra.mxu3 %v681_v5  ;;  %v580_v33 = vadd.f32 %v564_v2, %v530_v16  ;;  %v429_v34 = vadd.f32 %v413_v19, %v379_v17  ;;  %v513_v18 = vsel %vm496_vm4, %v1375_v15, 0.0  ;;  %v563_v35 = vsel %vm546_vm5, %v1389_v23, 0.0 }
  0x81   : > { %vm596_vm6 = vcmp.eq.s32.totalorder %v1716_v45, %v1391_v24  ;;  %710 = vmatpush.msra.mxu0 %v681_v5  ;;  %926 = vmatpush.msra.mxu1 %v681_v5  ;;  %vm295_vm7 = vcmp.eq.s32.totalorder %v1749_v61, %v1355_v6  ;;  %vm345_vm8 = vcmp.eq.s32.totalorder %v1749_v61, %v1359_v8 }
  0x82   : > { %v630_v21 = vadd.f32 %v614_v25, %v580_v33  ;;  %v479_v36 = vadd.f32 %v463_v30, %v429_v34  ;;  %vm646_vm9 = vcmp.eq.s32.totalorder %v1716_v45, %v1394_v27  ;;  %v312_v26 = vsel %vm295_vm7, %v1357_v7, 0.0  ;;  %v698_v33 = vld [vmem:[#allocation8 + $0x10] sm:$0xff]  ;;  %v697_v34 = vld [vmem:[#allocation8 + $0x8] sm:$0xff] }
  0x83   : > { %v362_v37 = vsel %vm345_vm8, %v1361_v9, 0.0  ;;  %vm395_vm10 = vcmp.eq.s32.totalorder %v1749_v61, %v1363_v10  ;;  %vm445_vm11 = vcmp.eq.s32.totalorder %v1749_v61, %v1367_v12  ;;  %vm495_vm12 = vcmp.eq.s32.totalorder %v1749_v61, %v1373_v14 }
  0x84   : > { %v680_v38 = vadd.f32 %v664_v20, %v630_v21  ;;  %v529_v39 = vadd.f32 %v513_v18, %v479_v36  ;;  %v378_v40 = vadd.f32 %v362_v37, %v312_v26  ;;  %v412_v42 = vsel %vm395_vm10, %v1365_v11, 0.0  ;;  %v696_v20 = vld [vmem:[#allocation8] sm:$0xff] }
  0x85   : > { %v613_v44 = vsel %vm596_vm6, %v1400_v29, 0.0  ;;  %v462_v46 = vsel %vm445_vm11, %v1369_v13, 0.0  ;;  %vm545_vm13 = vcmp.eq.s32.totalorder %v1749_v61, %v1387_v22  ;;  %v663_v48 = vsel %vm646_vm9, %v1408_v32, 0.0 }
  0x86   : > { %930 = vmatpush.msra.mxu2 %v680_v38  ;;  %931 = vmatpush.msra.mxu3 %v680_v38  ;;  %v579_v47 = vadd.f32 %v563_v35, %v529_v39  ;;  %v428_v28 = vadd.f32 %v412_v42, %v378_v40  ;;  %v512_v49 = vsel %vm495_vm12, %v1375_v15, 0.0  ;;  %v562_v41 = vsel %vm545_vm13, %v1389_v23, 0.0 }
  0x87   : > { %vm595_vm14 = vcmp.eq.s32.totalorder %v1749_v61, %v1391_v24  ;;  %711 = vmatpush.msra.mxu0 %v680_v38  ;;  %929 = vmatpush.msra.mxu1 %v680_v38  ;;  %vm294_vm15 = vcmp.eq.s32.totalorder %v1782_v31, %v1355_v6  ;;  %vm344_vm0 = vcmp.eq.s32.totalorder %v1782_v31, %v1359_v8 }
  0x88   : > { %v629_v50 = vadd.f32 %v613_v44, %v579_v47  ;;  %v478_v43 = vadd.f32 %v462_v46, %v428_v28  ;;  %vm645_vm1 = vcmp.eq.s32.totalorder %v1749_v61, %v1394_v27  ;;  %v311_v45 = vsel %vm294_vm15, %v1357_v7, 0.0 }
  0x89   : > { %v361_v51 = vsel %vm344_vm0, %v1361_v9, 0.0  ;;  %vm394_vm2 = vcmp.eq.s32.totalorder %v1782_v31, %v1363_v10  ;;  %vm444_vm3 = vcmp.eq.s32.totalorder %v1782_v31, %v1367_v12  ;;  %vm494_vm4 = vcmp.eq.s32.totalorder %v1782_v31, %v1373_v14 }
  0x8a   : > { %v679_v52 = vadd.f32 %v663_v48, %v629_v50  ;;  %v528_v53 = vadd.f32 %v512_v49, %v478_v43  ;;  %v377_v54 = vadd.f32 %v361_v51, %v311_v45  ;;  %v411_v56 = vsel %vm394_vm2, %v1365_v11, 0.0 }
  0x8b   : > { %v612_v58 = vsel %vm595_vm14, %v1400_v29, 0.0  ;;  %v461_v60 = vsel %vm444_vm3, %v1369_v13, 0.0  ;;  %vm544_vm5 = vcmp.eq.s32.totalorder %v1782_v31, %v1387_v22  ;;  %v662_v63 = vsel %vm645_vm1, %v1408_v32, 0.0 }
  0x8c   : > { %933 = vmatpush.msra.mxu2 %v679_v52  ;;  %934 = vmatpush.msra.mxu3 %v679_v52  ;;  %v578_v62 = vadd.f32 %v562_v41, %v528_v53  ;;  %v427_v0 = vadd.f32 %v411_v56, %v377_v54  ;;  %v511_v55 = vsel %vm494_vm4, %v1375_v15, 0.0  ;;  %v561_v2 = vsel %vm544_vm5, %v1389_v23, 0.0 }
  0x8d   : > { %vm594_vm6 = vcmp.eq.s32.totalorder %v1782_v31, %v1391_v24  ;;  %712 = vmatpush.msra.mxu0 %v679_v52  ;;  %932 = vmatpush.msra.mxu1 %v679_v52  ;;  %vm293_vm7 = vcmp.eq.s32.totalorder %v1349_v1, %v1355_v6  ;;  %vm343_vm8 = vcmp.eq.s32.totalorder %v1349_v1, %v1359_v8 }
  0x8e   : > { %v628_v57 = vadd.f32 %v612_v58, %v578_v62  ;;  %v477_v3 = vadd.f32 %v461_v60, %v427_v0  ;;  %vm644_vm9 = vcmp.eq.s32.totalorder %v1782_v31, %v1394_v27  ;;  %v310_v61 = vsel %vm293_vm7, %v1357_v7, 0.0 }
  0x8f   : > { %v360_v59 = vsel %vm343_vm8, %v1361_v9, 0.0  ;;  %vm393_vm10 = vcmp.eq.s32.totalorder %v1349_v1, %v1363_v10  ;;  %vm443_vm11 = vcmp.eq.s32.totalorder %v1349_v1, %v1367_v12  ;;  %vm493_vm12 = vcmp.eq.s32.totalorder %v1349_v1, %v1373_v14 }
  0x90   : > { %v678_v6 = vadd.f32 %v662_v63, %v628_v57  ;;  %v527_v8 = vadd.f32 %v511_v55, %v477_v3  ;;  %v376_v4 = vadd.f32 %v360_v59, %v310_v61  ;;  %v410_v5 = vsel %vm393_vm10, %v1365_v11, 0.0 }
  0x91   : > { %v611_v7 = vsel %vm594_vm6, %v1400_v29, 0.0  ;;  %v460_v9 = vsel %vm443_vm11, %v1369_v13, 0.0  ;;  %vm543_vm13 = vcmp.eq.s32.totalorder %v1349_v1, %v1387_v22  ;;  %v661_v12 = vsel %vm644_vm9, %v1408_v32, 0.0 }
  0x92   : > { %936 = vmatpush.msra.mxu2 %v678_v6  ;;  %937 = vmatpush.msra.mxu3 %v678_v6  ;;  %v577_v10 = vadd.f32 %v561_v2, %v527_v8  ;;  %v426_v16 = vadd.f32 %v410_v5, %v376_v4  ;;  %v510_v11 = vsel %vm493_vm12, %v1375_v15, 0.0  ;;  %vm593_vm14 = vcmp.eq.s32.totalorder %v1349_v1, %v1391_v24 }
  0x93   : > { %713 = vmatpush.msra.mxu0 %v678_v6  ;;  %935 = vmatpush.msra.mxu1 %v678_v6  ;;  %v560_v13 = vsel %vm543_vm13, %v1389_v23, 0.0  ;;  %vm643_vm15 = vcmp.eq.s32.totalorder %v1349_v1, %v1394_v27  ;;  %v610_v22 = vsel %vm593_vm14, %v1400_v29, 0.0  ;;  %v699_v23 = vld [vmem:[#allocation8 + $0x18] sm:$0xff] }
  0x94   : > { %v627_v14 = vadd.f32 %v611_v7, %v577_v10  ;;  %v476_v17 = vadd.f32 %v460_v9, %v426_v16  ;;  %v660_v15 = vsel %vm643_vm15, %v1408_v32, 0.0 }
  0x96   : > { %v677_v19 = vadd.f32 %v661_v12, %v627_v14  ;;  %v526_v25 = vadd.f32 %v510_v11, %v476_v17 }
  0x98   : > { %939 = vmatpush.msra.mxu2 %v677_v19  ;;  %940 = vmatpush.msra.mxu3 %v677_v19  ;;  %v576_v30 = vadd.f32 %v560_v13, %v526_v25 }
  0x99   : > { %714 = vmatpush.msra.mxu0 %v677_v19  ;;  %938 = vmatpush.msra.mxu1 %v677_v19 }
  0x9a   : > { %v626_v31 = vadd.f32 %v610_v22, %v576_v30 }
  0x9c   : > { %v676_v24 = vadd.f32 %v660_v15, %v626_v31 }
  0x9e   : > { %942 = vmatpush.msra.mxu2 %v676_v24  ;;  %943 = vmatpush.msra.mxu3 %v676_v24 }
  0x9f   : > { %722 = vmatmul.f32.vlgmr.msra.gmra.mxu2 %v698_v33  ;;  %725 = vmatmul.f32.vlgmr.msra.gmra.mxu3 %v699_v23 }
  0xa0   : > { %715 = vmatpush.msra.mxu0 %v676_v24  ;;  %941 = vmatpush.msra.mxu1 %v676_v24 }
  0xa1   : > { %716 = vmatmul.f32.vlgmr.msra.gmra.mxu0 %v696_v20  ;;  %719 = vmatmul.f32.vlgmr.msra.gmra.mxu1 %v697_v34 }
 0x11e   : > { %v717_v1 = vpop.f32.mrf.mxu0  ;;  %v720_v27 = vpop.f32.mrf.mxu1 }
 0x11f   : > { %744 = vst [vmem:[%s261_s21] sm:$0xff] %v717_v1 }
 0x120   : > { %745 = vst [vmem:[%s261_s21 + $0x8] sm:$0xff] %v720_v27 }
 0x122   : > { %v723_v29 = vpop.f32.mrf.mxu2  ;;  %v726_v32 = vpop.f32.mrf.mxu3 }
 0x123   : > { %746 = vst [vmem:[%s261_s21 + $0x10] sm:$0xff] %v723_v29 }
 0x124   : > { %747 = vst [vmem:[%s261_s21 + $0x18] sm:$0xff] %v726_v32 }
 0x125   : > { %1144 = shalt.err (!%p1141_p13)
}
 0x126   : > { %s1212_s30 = smov 128   ;;  %s1213_s20 = smov 256  }
 0x127   : > { %s1214_s9 = smov 8  }
 0x128   : > { %952 = dma.vmem_to_hbm [thread:$0]  (%p1306_p4), %s761_s23, 512, %s763_s24, %s749_s25, %s1212_s30, %s1213_s20, %s1214_s9  }
 0x129 PF: > { %s777_s2 = sand.u32 1, %s1187_s12   ;;  %p966_p0 = pnand %p882_p6, %p1314_p7 }
 0x12a   : > { %s778_s16 = scalar_lea.sflag [#allocation5], %s777_s2 }
 0x12b   : > { %p967_p2 = pneg %p966_p0 }
 0x12d   : > { %1182 = dma.done.wait (%p967_p2), %s778_s16, 512  }
 0x12e   : > { %1184 = vsyncadd (%p967_p2), %s778_s16, 4294966784  ;;  %s22_s17 = sadd.s32 1, %s1207_s17   ;;  %s1941_s22 = sld [smem:[#allocation16_spill]] }
 0x12f   : > { %p19_p5 = scmp.ge.s32.totalorder %s22_s17, 4   ;;  %s1942_s15 = sld [smem:[#allocation14_spill]] }
 0x130   : > { %s1943_s16 = sld [smem:[#allocation15_spill]]  ;;  %s1944_s12 = smov %s1191_s13 }
 0x131   : > { %s1945_s13 = smov %s1195_s14  ;;  %21 = sbr.rel (!%p19_p5) target bundleno = 10 (0xa), region = 103 }
 0x134   : > { %s1946_s14 = smov %s1941_s22 }
 0x136   :  { %784 = vsyncpa [#allocation4], 1 }
 0x137   :  { %786 = vsyncpa [#allocation4 + $0x1], 1 }
 0x138   :  { %787 = vsyncpa [#allocation7], 1 }
 0x139   :  { %789 = vsyncpa [#allocation7 + $0x1], 1 }
 0x13a   :  { %790 = vsyncpa [#allocation5], 1 }
 0x13b   :  { %792 = vsyncpa [#allocation5 + $0x1], 1 }

</bundles_post_ra>
